<compile_context>
chip_gen: v7x
topology: tpu7x:2x2x1
jax: 0.10.0
libtpu: 0.0.40
codegen_flags: <defaults>
</compile_context>

<pallas_src>
import functools
import numpy as np

import jax
import jax.numpy as jnp
from jax import lax
from jax.experimental import pallas as pl
from jax.experimental.pallas import tpu as pltpu


def _vmem_limit_bytes():
    cap = 128 * 1024 * 1024
    try:
        info = pltpu.get_tpu_info()
        cap = int(getattr(info, "vmem_capacity_bytes", cap) or cap)
    except Exception:
        pass
    # 3/4 of physical VMEM, capped at 100 MiB (96 MiB on v5e/v6e, 48 MiB on v7x).
    return int(min(100 * 1024 * 1024, cap * 3 // 4))


VMEM_LIMIT = _vmem_limit_bytes()

# Matmul tiles (plain K-tiled matmul) and fused-RMSNorm tiles.
TM, TN, TK = 512, 512, 512
TMF, TNF = 256, 512
# Attention tiles (kept moderate so q/k/v + f32 acc fit v7x's 64 MiB VMEM too).
TQ, TKV = 256, 256


def _fit(dim, desired, align):
    """Largest tile <= desired that divides dim and is a multiple of align; falls back
    to the full dim (which always satisfies the (8,128) rule).  Used only where exact
    tiling is required (K reduction, attention seq)."""
    if dim <= desired:
        return dim
    t = desired
    while t >= align:
        if dim % t == 0:
            return t
        t //= 2
    return dim


def _cp(sem):
    return pltpu.CompilerParams(dimension_semantics=sem, vmem_limit_bytes=VMEM_LIMIT)


# ----------------------------------------------------------------------------
# Pallas kernels
# ----------------------------------------------------------------------------
def _matmul_kernel(*refs, act, has_bias, has_residual, nk):
    x_ref, w_ref = refs[0], refs[1]
    i = 2
    b_ref = refs[i] if has_bias else None
    i += int(has_bias)
    r_ref = refs[i] if has_residual else None
    i += int(has_residual)
    o_ref, acc_ref = refs[i], refs[i + 1]

    @pl.when(pl.program_id(2) == 0)
    def _():
        acc_ref[...] = jnp.zeros(acc_ref.shape, acc_ref.dtype)

    acc_ref[...] += jnp.dot(x_ref[...].astype(jnp.bfloat16),
                            w_ref[...].astype(jnp.bfloat16),
                            preferred_element_type=jnp.float32)

    @pl.when(pl.program_id(2) == nk - 1)
    def _():
        y = acc_ref[...]
        if has_bias:
            y = y + b_ref[...].astype(jnp.float32)
        if act == "gelu":                      # exact (erf) GELU
            y = 0.5 * y * (1.0 + lax.erf(y * (1.0 / np.sqrt(2.0))))
        elif act == "silu":
            y = y * (1.0 / (1.0 + jnp.exp(-y)))
        if has_residual:
            y = y + r_ref[...].astype(jnp.float32)
        o_ref[...] = y.astype(o_ref.dtype)


def _rms_matmul_kernel(*refs, eps, has_bias):
    x_ref, g_ref, w_ref = refs[0], refs[1], refs[2]
    i = 3
    b_ref = refs[i] if has_bias else None
    i += int(has_bias)
    o_ref = refs[i]

    x = x_ref[...].astype(jnp.float32)
    var = jnp.mean(x * x, axis=-1, keepdims=True)
    xn = (x * lax.rsqrt(var + eps)) * g_ref[...].astype(jnp.float32)
    y = jnp.dot(xn.astype(jnp.bfloat16), w_ref[...].astype(jnp.bfloat16),
                preferred_element_type=jnp.float32)
    if has_bias:
        y = y + b_ref[...].astype(jnp.float32)
    o_ref[...] = y.astype(o_ref.dtype)


def _rms_gated_mlp_kernel(*refs, eps, has_bias):
    x_ref, g_ref, wg_ref = refs[0], refs[1], refs[2]
    i = 3
    bg_ref = refs[i] if has_bias else None
    i += int(has_bias)
    wu_ref = refs[i]
    i += 1
    bu_ref = refs[i] if has_bias else None
    i += int(has_bias)
    o_ref = refs[i]

    x = x_ref[...].astype(jnp.float32)
    var = jnp.mean(x * x, axis=-1, keepdims=True)
    xn = ((x * lax.rsqrt(var + eps)) * g_ref[...].astype(jnp.float32)
          ).astype(jnp.bfloat16)
    g = jnp.dot(xn, wg_ref[...].astype(jnp.bfloat16),
                preferred_element_type=jnp.float32)
    u = jnp.dot(xn, wu_ref[...].astype(jnp.bfloat16),
                preferred_element_type=jnp.float32)
    if has_bias:
        g = g + bg_ref[...].astype(jnp.float32)
        u = u + bu_ref[...].astype(jnp.float32)
    g = g * (1.0 / (1.0 + jnp.exp(-g)))          # SiLU
    o_ref[...] = (g * u).astype(o_ref.dtype)


def _rmsnorm_kernel(x_ref, g_ref, o_ref, *, eps):
    x = x_ref[...].astype(jnp.float32)
    var = jnp.mean(x * x, axis=-1, keepdims=True)
    o_ref[...] = (x * lax.rsqrt(var + eps) *
                  g_ref[...].astype(jnp.float32)).astype(o_ref.dtype)


def _rope_kernel(x_ref, cos_ref, sin_ref, o_ref, *, half, scale):
    x = x_ref[0].astype(jnp.float32)             # (ts, D)
    x1 = x[:, :half]
    x2 = x[:, half:]
    rot = jnp.concatenate([-x2, x1], axis=-1)
    y = x * cos_ref[...].astype(jnp.float32) + rot * sin_ref[...].astype(jnp.float32)
    if scale != 1.0:                              # softmax scale folded into q
        y = y * scale
    o_ref[0] = y.astype(o_ref.dtype)


def _flash_attn_kernel(qmin_ref, qmax_ref, kmin_ref, kmax_ref,
                       q_ref, k_ref, v_ref, segq_ref, segk_ref,
                       o_ref, m_sc, l_sc, acc_sc, *, causal, use_seg, tq, tkv):
    # Grid indices hoisted to the top level (never call pl.program_id inside pl.when).
    qi = pl.program_id(1)
    ki = pl.program_id(2)
    nkv = pl.num_programs(2)

    @pl.when(ki == 0)
    def _():
        m_sc[...] = jnp.full(m_sc.shape, -jnp.inf, m_sc.dtype)
        l_sc[...] = jnp.zeros(l_sc.shape, l_sc.dtype)
        acc_sc[...] = jnp.zeros(acc_sc.shape, acc_sc.dtype)

    def compute(masked):
        q = q_ref[0]                              # (tq, D) bf16, RoPE + scale applied
        k = k_ref[0]                              # (tkv, D) bf16
        s = lax.dot_general(q, k, (((1,), (1,)), ((), ())),
                            preferred_element_type=jnp.float32)
        if masked:
            mask = None
            if use_seg:
                mask = segq_ref[...] == segk_ref[...]   # (tq,1)==(1,tkv)
            if causal:
                row = qi * tq + lax.broadcasted_iota(jnp.int32, s.shape, 0)
                col = ki * tkv + lax.broadcasted_iota(jnp.int32, s.shape, 1)
                cm = col <= row
                mask = cm if mask is None else jnp.logical_and(mask, cm)
            s = jnp.where(mask, s, -1e30)
        m_prev = m_sc[...]
        m_new = jnp.maximum(m_prev, jnp.max(s, axis=-1, keepdims=True))
        alpha = jnp.exp(m_prev - m_new)
        p = jnp.exp(s - m_new)
        l_sc[...] = alpha * l_sc[...] + jnp.sum(p, axis=-1, keepdims=True)
        acc_sc[...] = alpha * acc_sc[...] + jnp.dot(
            p.astype(jnp.bfloat16), v_ref[0], preferred_element_type=jnp.float32)
        m_sc[...] = m_new

    work_conds, mask_conds = [], []
    if causal:
        work_conds.append(ki * tkv <= qi * tq + (tq - 1))       # not above diagonal
        mask_conds.append((ki + 1) * tkv - 1 > qi * tq)         # crosses the diagonal
    if use_seg:
        sq_min, sq_max = qmin_ref[qi], qmax_ref[qi]
        sk_min, sk_max = kmin_ref[ki], kmax_ref[ki]
        work_conds.append(jnp.logical_and(sq_max >= sk_min, sq_min <= sk_max))
        uniform = jnp.logical_and(sq_min == sq_max,
                                  jnp.logical_and(sk_min == sk_max, sq_min == sk_min))
        mask_conds.append(jnp.logical_not(uniform))

    if not work_conds:
        compute(masked=False)
    else:
        has_work = functools.reduce(jnp.logical_and, work_conds)
        needs_mask = functools.reduce(jnp.logical_or, mask_conds)

        @pl.when(jnp.logical_and(has_work, needs_mask))
        def _():
            compute(masked=True)

        @pl.when(jnp.logical_and(has_work, jnp.logical_not(needs_mask)))
        def _():
            compute(masked=False)

    @pl.when(ki == nkv - 1)
    def _():
        o_ref[0] = (acc_sc[...] * (1.0 / l_sc[...])).astype(o_ref.dtype)


def _lm_head_kernel(x_ref, e_ref, o_ref):
    o_ref[...] = lax.dot_general(
        x_ref[...].astype(jnp.bfloat16), e_ref[...].astype(jnp.bfloat16),
        (((1,), (1,)), ((), ())),
        preferred_element_type=jnp.float32).astype(o_ref.dtype)


# ----------------------------------------------------------------------------
# Kernel wrappers
# ----------------------------------------------------------------------------
def matmul(x, w, b=None, act=None, residual=None):
    """Tiled y = act(x @ W + b) (+ residual); K tiled exactly, M/N via cdiv with masked
    edge blocks.  Output bf16, accumulation f32."""
    M, K = x.shape
    N = w.shape[1]
    tm = M if M <= TM else TM
    tn = N if N <= TN else TN
    tk = _fit(K, TK, 128)
    nk = K // tk
    has_bias = b is not None
    has_res = residual is not None

    in_specs = [pl.BlockSpec((tm, tk), lambda i, j, k: (i, k)),
                pl.BlockSpec((tk, tn), lambda i, j, k: (k, j))]
    args = [x, w]
    if has_bias:
        in_specs.append(pl.BlockSpec((1, tn), lambda i, j, k: (0, j)))
        args.append(b.reshape(1, N))
    if has_res:
        in_specs.append(pl.BlockSpec((tm, tn), lambda i, j, k: (i, j)))
        args.append(residual)

    kern = functools.partial(_matmul_kernel, act=act, has_bias=has_bias,
                             has_residual=has_res, nk=nk)
    return pl.pallas_call(
        kern,
        out_shape=jax.ShapeDtypeStruct((M, N), jnp.bfloat16),
        grid=(pl.cdiv(M, tm), pl.cdiv(N, tn), nk),
        in_specs=in_specs,
        out_specs=pl.BlockSpec((tm, tn), lambda i, j, k: (i, j)),
        scratch_shapes=[pltpu.VMEM((tm, tn), jnp.float32)],
        compiler_params=_cp(("parallel", "parallel", "arbitrary")),
    )(*args)


def rms_matmul(x, gamma, w, b=None, eps=1e-6):
    """Fused RMSNorm(x) @ W (+ b).  K kept whole so the row reduction is exact."""
    M, K = x.shape
    N = w.shape[1]
    tm = M if M <= TMF else TMF
    tn = N if N <= TNF else TNF
    has_bias = b is not None
    in_specs = [pl.BlockSpec((tm, K), lambda i, j: (i, 0)),
                pl.BlockSpec((1, K), lambda i, j: (0, 0)),
                pl.BlockSpec((K, tn), lambda i, j: (0, j))]
    args = [x, gamma.reshape(1, K), w]
    if has_bias:
        in_specs.append(pl.BlockSpec((1, tn), lambda i, j: (0, j)))
        args.append(b.reshape(1, N))
    kern = functools.partial(_rms_matmul_kernel, eps=eps, has_bias=has_bias)
    return pl.pallas_call(
        kern,
        out_shape=jax.ShapeDtypeStruct((M, N), jnp.bfloat16),
        grid=(pl.cdiv(M, tm), pl.cdiv(N, tn)),
        in_specs=in_specs,
        out_specs=pl.BlockSpec((tm, tn), lambda i, j: (i, j)),
        compiler_params=_cp(("parallel", "parallel")),
    )(*args)


def rms_gated_mlp(x, gamma, wg, bg, wu, bu, eps=1e-6):
    """Fused RMSNorm(x) -> SiLU(x@Wg+bg) * (x@Wu+bu)."""
    M, K = x.shape
    N = wg.shape[1]
    tm = M if M <= TMF else TMF
    # Two (K, tn) bf16 weight blocks are live, keep tn moderate when K is huge (v7x).
    tn_target = 256 if K > 8192 else TNF
    tn = N if N <= tn_target else tn_target
    has_bias = bg is not None
    in_specs = [pl.BlockSpec((tm, K), lambda i, j: (i, 0)),
                pl.BlockSpec((1, K), lambda i, j: (0, 0)),
                pl.BlockSpec((K, tn), lambda i, j: (0, j))]
    args = [x, gamma.reshape(1, K), wg]
    if has_bias:
        in_specs.append(pl.BlockSpec((1, tn), lambda i, j: (0, j)))
        args.append(bg.reshape(1, N))
    in_specs.append(pl.BlockSpec((K, tn), lambda i, j: (0, j)))
    args.append(wu)
    if has_bias:
        in_specs.append(pl.BlockSpec((1, tn), lambda i, j: (0, j)))
        args.append(bu.reshape(1, N))
    kern = functools.partial(_rms_gated_mlp_kernel, eps=eps, has_bias=has_bias)
    return pl.pallas_call(
        kern,
        out_shape=jax.ShapeDtypeStruct((M, N), jnp.bfloat16),
        grid=(pl.cdiv(M, tm), pl.cdiv(N, tn)),
        in_specs=in_specs,
        out_specs=pl.BlockSpec((tm, tn), lambda i, j: (i, j)),
        compiler_params=_cp(("parallel", "parallel")),
    )(*args)


def rmsnorm(x, gamma, eps=1e-6):
    M, D = x.shape
    tm = M if M <= TMF else TMF
    kern = functools.partial(_rmsnorm_kernel, eps=eps)
    return pl.pallas_call(
        kern,
        out_shape=jax.ShapeDtypeStruct((M, D), jnp.bfloat16),
        grid=(pl.cdiv(M, tm),),
        in_specs=[pl.BlockSpec((tm, D), lambda i: (i, 0)),
                  pl.BlockSpec((1, D), lambda i: (0, 0))],
        out_specs=pl.BlockSpec((tm, D), lambda i: (i, 0)),
        compiler_params=_cp(("parallel",)),
    )(x, gamma.reshape(1, D))


def apply_rope(x, cos, sin, scale=1.0):
    """x: (H, S, D) -> RoPE'd bf16 (computed once, hoisted out of attention).
    Grid is (seq, head) so cos/sin tiles stay resident across heads; the softmax
    scale can be folded in (pass scale for q)."""
    H, S, D = x.shape
    ts = _fit(S, TQ, 8)
    kern = functools.partial(_rope_kernel, half=D // 2, scale=float(scale))
    return pl.pallas_call(
        kern,
        out_shape=jax.ShapeDtypeStruct((H, S, D), jnp.bfloat16),
        grid=(S // ts, H),
        in_specs=[pl.BlockSpec((1, ts, D), lambda s, h: (h, s, 0)),
                  pl.BlockSpec((ts, D), lambda s, h: (s, 0)),
                  pl.BlockSpec((ts, D), lambda s, h: (s, 0))],
        out_specs=pl.BlockSpec((1, ts, D), lambda s, h: (h, s, 0)),
        compiler_params=_cp(("parallel", "parallel")),
    )(x, cos, sin)


def flash_attention(q, k, v, seg, causal, use_seg=True):
    """q, k, v: (H, S, D) bf16 (q already scaled by 1/sqrt(D) and RoPE'd).
    seg: (S,) int32 segment ids (window / image boundaries).  Online-softmax flash
    attention; per-tile segment min/max scalars (SMEM prefetch) gate the work and
    masking, causal KV DMAs above the diagonal are elided via the index_map."""
    H, S, D = q.shape
    tq = _fit(S, TQ, 8)
    tkv = _fit(S, TKV, 128)
    nq, nkv = S // tq, S // tkv
    seg = jnp.asarray(seg, jnp.int32)
    seg_col = seg.reshape(S, 1)
    seg_row = seg.reshape(1, S)
    qmin = seg.reshape(nq, tq).min(axis=1).astype(jnp.int32)
    qmax = seg.reshape(nq, tq).max(axis=1).astype(jnp.int32)
    kmin = seg.reshape(nkv, tkv).min(axis=1).astype(jnp.int32)
    kmax = seg.reshape(nkv, tkv).max(axis=1).astype(jnp.int32)

    if causal:
        def kv_map(h, qi, ki, *_):
            last = (qi * tq + (tq - 1)) // tkv            # last KV tile with work
            return (h, jnp.minimum(ki, last), 0)          # repeat => DMA elided
    else:
        def kv_map(h, qi, ki, *_):
            return (h, ki, 0)

    kern = functools.partial(_flash_attn_kernel, causal=causal, use_seg=use_seg,
                             tq=tq, tkv=tkv)
    grid_spec = pltpu.PrefetchScalarGridSpec(
        num_scalar_prefetch=4,
        grid=(H, nq, nkv),
        in_specs=[pl.BlockSpec((1, tq, D), lambda h, qi, ki, *_: (h, qi, 0)),
                  pl.BlockSpec((1, tkv, D), kv_map),
                  pl.BlockSpec((1, tkv, D), kv_map),
                  pl.BlockSpec((tq, 1), lambda h, qi, ki, *_: (qi, 0)),
                  pl.BlockSpec((1, tkv), lambda h, qi, ki, *_: (0, ki))],
        out_specs=pl.BlockSpec((1, tq, D), lambda h, qi, ki, *_: (h, qi, 0)),
        scratch_shapes=[pltpu.VMEM((tq, 1), jnp.float32),
                        pltpu.VMEM((tq, 1), jnp.float32),
                        pltpu.VMEM((tq, D), jnp.float32)])
    return pl.pallas_call(
        kern,
        out_shape=jax.ShapeDtypeStruct((H, S, D), jnp.bfloat16),
        grid_spec=grid_spec,
        compiler_params=_cp(("parallel", "parallel", "arbitrary")),
    )(qmin, qmax, kmin, kmax, q, k, v, seg_col, seg_row)


def lm_head(x, embed):
    """Tied lm_head: x (M, H) @ embed.T, streaming untransposed vocab tiles with a
    cdiv grid (edge tile masked), so huge vocabs get 1024-row lane-dense tiles."""
    M, K = x.shape
    V = embed.shape[0]
    tv = V if V <= 1024 else 1024
    return pl.pallas_call(
        _lm_head_kernel,
        out_shape=jax.ShapeDtypeStruct((M, V), jnp.float32),
        grid=(pl.cdiv(V, tv),),
        in_specs=[pl.BlockSpec((M, K), lambda j: (0, 0)),
                  pl.BlockSpec((tv, K), lambda j: (j, 0))],
        out_specs=pl.BlockSpec((M, tv), lambda j: (0, j)),
        compiler_params=_cp(("parallel",)),
    )(x, embed)


# ----------------------------------------------------------------------------
# Host-side glue reproducing the PyTorch integer bookkeeping
# ----------------------------------------------------------------------------
def get_window_index_np(grid_thw, window_size, spatial_merge_size, patch_size,
                        spatial_merge_unit):
    cu_window_seqlens = [0]
    window_index = []
    window_index_id = 0
    vit_merger_window_size = window_size // spatial_merge_size // patch_size
    for grid_t, grid_h, grid_w in grid_thw:
        llm_h, llm_w = grid_h // spatial_merge_size, grid_w // spatial_merge_size
        index = np.arange(grid_t * llm_h * llm_w).reshape(grid_t, llm_h, llm_w)
        pad_h = vit_merger_window_size - llm_h % vit_merger_window_size
        pad_w = vit_merger_window_size - llm_w % vit_merger_window_size
        num_wh = (llm_h + pad_h) // vit_merger_window_size
        num_ww = (llm_w + pad_w) // vit_merger_window_size
        index_padded = np.pad(index, ((0, 0), (0, pad_h), (0, pad_w)),
                              constant_values=-100)
        index_padded = index_padded.reshape(grid_t, num_wh, vit_merger_window_size,
                                            num_ww, vit_merger_window_size)
        index_padded = index_padded.transpose(0, 1, 3, 2, 4).reshape(
            grid_t, num_wh * num_ww, vit_merger_window_size, vit_merger_window_size)
        seqlens = (index_padded != -100).sum(axis=(2, 3)).reshape(-1)
        index_padded = index_padded.reshape(-1)
        index_new = index_padded[index_padded != -100]
        window_index.append(index_new + window_index_id)
        cu_tmp = np.cumsum(seqlens) * spatial_merge_unit + cu_window_seqlens[-1]
        cu_window_seqlens.extend(cu_tmp.tolist())
        window_index_id += int(grid_t * llm_h * llm_w)
    return np.concatenate(window_index), np.asarray(cu_window_seqlens, np.int64)


def rot_pos_emb_np(grid_thw, spatial_merge_size, head_dim):
    sm = spatial_merge_size
    pos_ids = []
    for t, h, w in grid_thw:
        hpos = np.broadcast_to(np.arange(h)[:, None], (h, w))
        hpos = hpos.reshape(h // sm, sm, w // sm, sm).transpose(0, 2, 1, 3).reshape(-1)
        wpos = np.broadcast_to(np.arange(w)[None, :], (h, w))
        wpos = wpos.reshape(h // sm, sm, w // sm, sm).transpose(0, 2, 1, 3).reshape(-1)
        pos_ids.append(np.tile(np.stack([hpos, wpos], axis=-1), (t, 1)))
    pos_ids = np.concatenate(pos_ids, axis=0)
    max_grid = int(np.asarray(grid_thw)[:, 1:].max())
    dim = head_dim // 2
    inv_freq = 1.0 / (10000.0 ** (np.arange(0, dim, 2, dtype=np.float64) / dim))
    freqs = np.outer(np.arange(max_grid, dtype=np.float64), inv_freq)
    rpe = freqs[pos_ids]                        # (seq, 2, dim//2)
    return rpe.reshape(pos_ids.shape[0], -1)    # (seq, head_dim//2)


def mrope_cos_sin_np(positions, head_dim, mrope_section, theta):
    inv_freq = 1.0 / (theta ** (np.arange(0, head_dim, 2, dtype=np.float64) / head_dim))
    freqs = positions[:, :, None].astype(np.float64) * inv_freq[None, None, :]
    emb = np.concatenate([freqs, freqs], axis=-1)          # (3, S, head_dim)
    cos3, sin3 = np.cos(emb), np.sin(emb)
    sections = list(mrope_section) * 2
    splits = np.cumsum(sections)[:-1]
    cos = np.concatenate([c[i % 3] for i, c in enumerate(np.split(cos3, splits, -1))], -1)
    sin = np.concatenate([s[i % 3] for i, s in enumerate(np.split(sin3, splits, -1))], -1)
    return cos.astype(np.float32), sin.astype(np.float32)


def seg_ids_from_cu(cu, seq):
    return (np.searchsorted(np.asarray(cu), np.arange(seq), side="right") - 1).astype(np.int32)


# ----------------------------------------------------------------------------
# Parameter init (deterministic, synthetic).  Matmul weights stored in bf16.
# ----------------------------------------------------------------------------
class KeyGen:
    def __init__(self, key):
        self.key = key

    def __call__(self):
        self.key, sub = jax.random.split(self.key)
        return sub


def _w(kg, shape, scale=0.02):
    return (scale * jax.random.normal(kg(), shape, jnp.float32)).astype(jnp.bfloat16)


def _b(kg, shape, scale=0.01):
    return scale * jax.random.normal(kg(), shape, jnp.float32)


def init_params(key, cfg):
    kg = KeyGen(key)
    H = cfg["v_hidden"]; I = cfg["v_inter"]
    in_dim = cfg["in_channels"] * cfg["temporal_patch_size"] * cfg["patch_size"] ** 2
    merge_dim = H * cfg["spatial_merge_size"] ** 2

    vision = {"patch_w": _w(kg, (in_dim, H)), "blocks": []}
    for _ in range(cfg["v_depth"]):
        vision["blocks"].append(dict(
            norm1=jnp.ones((H,), jnp.float32), norm2=jnp.ones((H,), jnp.float32),
            wqkv=_w(kg, (H, 3 * H)), bqkv=_b(kg, (3 * H,)),
            wo=_w(kg, (H, H)), bo=_b(kg, (H,)),
            wg=_w(kg, (H, I)), bg=_b(kg, (I,)),
            wu=_w(kg, (H, I)), bu=_b(kg, (I,)),
            wd=_w(kg, (I, H)), bd=_b(kg, (H,))))
    vision["merger"] = dict(
        ln_q=jnp.ones((H,), jnp.float32),
        w1=_w(kg, (merge_dim, merge_dim)), b1=_b(kg, (merge_dim,)),
        w2=_w(kg, (merge_dim, cfg["out_hidden"])), b2=_b(kg, (cfg["out_hidden"],)))

    LH = cfg["hidden"]; LI = cfg["inter"]; V = cfg["vocab"]
    lm = {"embed": _w(kg, (V, LH)), "layers": [],
          "final_ln": jnp.ones((LH,), jnp.float32)}
    for _ in range(cfg["num_layers"]):
        lm["layers"].append(dict(
            in_ln=jnp.ones((LH,), jnp.float32), post_ln=jnp.ones((LH,), jnp.float32),
            wqkv=_w(kg, (LH, 3 * LH)), bqkv=_b(kg, (3 * LH,)),
            wo=_w(kg, (LH, LH)),
            wg=_w(kg, (LH, LI)), wu=_w(kg, (LH, LI)), wd=_w(kg, (LI, LH))))
    return {"vision": vision, "lm": lm}


# ----------------------------------------------------------------------------
# Model forward
# ----------------------------------------------------------------------------
def _split_heads(t, num_heads, head_dim):
    S = t.shape[0]
    return jnp.transpose(t.reshape(S, num_heads, head_dim), (1, 0, 2))


def _merge_heads(t):
    H, S, D = t.shape
    return jnp.transpose(t, (1, 0, 2)).reshape(S, H * D)


def vision_block(x, p, cos, sin, seg, num_heads):
    S, dim = x.shape
    D = dim // num_heads
    scale = 1.0 / float(np.sqrt(D))
    qkv = rms_matmul(x, p["norm1"], p["wqkv"], p["bqkv"])          # fused norm1 + QKV
    q, k, v = jnp.split(qkv, 3, axis=-1)
    qh = apply_rope(_split_heads(q, num_heads, D), cos, sin, scale=scale)
    kh = apply_rope(_split_heads(k, num_heads, D), cos, sin)
    vh = _split_heads(v, num_heads, D).astype(jnp.bfloat16)
    o = flash_attention(qh, kh, vh, seg, causal=False, use_seg=True)
    x = matmul(_merge_heads(o), p["wo"], p["bo"], residual=x)      # fused residual add
    m = rms_gated_mlp(x, p["norm2"], p["wg"], p["bg"], p["wu"], p["bu"])
    x = matmul(m, p["wd"], p["bd"], residual=x)                    # fused residual add
    return x


def vision_forward(vp, pixel_values, grid_thw, cfg):
    sm = cfg["spatial_merge_size"]; smu = sm * sm
    num_heads = cfg["v_num_heads"]; H = cfg["v_hidden"]
    head_dim = H // num_heads
    seq = pixel_values.shape[0]

    # patch embed (Conv3d kernel==stride, bias=False) as a matmul
    x = matmul(pixel_values, vp["patch_w"])

    rpe = rot_pos_emb_np(grid_thw, sm, head_dim)
    window_index, cu_window = get_window_index_np(
        grid_thw, cfg["window_size"], sm, cfg["patch_size"], smu)
    keep = np.concatenate([[True], cu_window[1:] != cu_window[:-1]])   # unique_consecutive
    cu_window = cu_window[keep]

    x = x.reshape(seq // smu, smu, -1)[window_index].reshape(seq, -1)
    rpe = rpe.reshape(seq // smu, smu, -1)[window_index].reshape(seq, -1)
    emb = np.concatenate([rpe, rpe], axis=-1)
    cos = jnp.asarray(np.cos(emb), jnp.float32)
    sin = jnp.asarray(np.sin(emb), jnp.float32)

    cu_full = np.concatenate(
        [[0], np.cumsum(grid_thw[:, 0] * grid_thw[:, 1] * grid_thw[:, 2])])
    cu_full = np.concatenate([[0], cu_full])   # matches reference F.pad((1,0)); seg ids
    seg_full = jnp.asarray(seg_ids_from_cu(cu_full, seq))   # are shift-invariant
    seg_win = jnp.asarray(seg_ids_from_cu(cu_window, seq))

    for i, bp in enumerate(vp["blocks"]):
        seg = seg_full if i in cfg["fullatt_block_indexes"] else seg_win
        x = vision_block(x, bp, cos, sin, seg, num_heads)

    m = vp["merger"]
    x = rmsnorm(x, m["ln_q"])
    x = x.reshape(-1, H * smu)
    x = matmul(x, m["w1"], m["b1"], act="gelu")
    x = matmul(x, m["w2"], m["b2"])
    reverse_indices = np.argsort(window_index)
    return x[reverse_indices]


def lm_forward(lp, input_ids_np, image_positions, image_embeds, mrope_positions, cfg):
    LH = cfg["hidden"]; nh = cfg["num_heads"]; D = LH // nh
    S = input_ids_np.shape[0]
    h = lp["embed"][jnp.asarray(input_ids_np)]                        # bf16 embed_tokens
    h = h.at[jnp.asarray(image_positions)].set(image_embeds.astype(h.dtype))

    cos_np, sin_np = mrope_cos_sin_np(mrope_positions, D, cfg["mrope_section"],
                                      cfg["rope_theta"])
    cos = jnp.asarray(cos_np); sin = jnp.asarray(sin_np)
    seg = jnp.zeros((S,), jnp.int32)
    scale = 1.0 / float(np.sqrt(D))

    for lpar in lp["layers"]:
        qkv = rms_matmul(h, lpar["in_ln"], lpar["wqkv"], lpar["bqkv"])   # fused norm+QKV
        q, k, v = jnp.split(qkv, 3, axis=-1)
        qh = apply_rope(_split_heads(q, nh, D), cos, sin, scale=scale)
        kh = apply_rope(_split_heads(k, nh, D), cos, sin)
        vh = _split_heads(v, nh, D).astype(jnp.bfloat16)
        o = flash_attention(qh, kh, vh, seg, causal=True, use_seg=False)
        h = matmul(_merge_heads(o), lpar["wo"], residual=h)              # no o_proj bias
        mm = rms_gated_mlp(h, lpar["post_ln"], lpar["wg"], None, lpar["wu"], None)
        h = matmul(mm, lpar["wd"], residual=h)
    h = rmsnorm(h, lp["final_ln"])
    # tied lm_head: logits for the last position (LogitsProcessor prefill behavior),
    # vocab-tiled, weight read untransposed (no transpose copy).
    return lm_head(h[-1:, :], lp["embed"])


def qwen25_vl_forward(params, input_ids_np, mrope_positions, pixel_values, grid_thw, cfg):
    image_embeds = vision_forward(params["vision"], pixel_values, grid_thw, cfg)
    image_positions = np.where(input_ids_np == cfg["image_token_id"])[0]
    assert image_positions.shape[0] == image_embeds.shape[0]
    return lm_forward(params["lm"], input_ids_np, image_positions, image_embeds,
                      mrope_positions, cfg)


# TODO(synk): ForwardBatch / general_mm_embed_routine / Pooler / weight_loader plumbing
# from sglang has no Pallas equivalent; the multimodal scatter + prefill path is
# reproduced directly.

# ----------------------------------------------------------------------------
if __name__ == "__main__":
    cfg = dict(
        # vision config
        patch_size=2, temporal_patch_size=2, spatial_merge_size=2, in_channels=3,
        v_hidden=32, v_depth=2, v_num_heads=2, v_inter=64,
        window_size=8, fullatt_block_indexes=[1], out_hidden=32,
        # language model config
        hidden=32, inter=64, num_heads=2, num_layers=2, vocab=128,
        rope_theta=10000.0, mrope_section=[2, 3, 3], image_token_id=5,
    )

    key = jax.random.PRNGKey(0)
    params = init_params(key, cfg)

    # one image: t=1, h=8, w=8 patches -> 64 patches, each flattened to C*T*P*P = 24
    grid_thw = np.array([[1, 8, 8]], dtype=np.int64)
    num_patches = int(grid_thw[0, 0] * grid_thw[0, 1] * grid_thw[0, 2])
    patch_dim = cfg["in_channels"] * cfg["temporal_patch_size"] * cfg["patch_size"] ** 2
    pixel_values = jax.random.normal(jax.random.PRNGKey(1),
                                     (num_patches, patch_dim), jnp.float32)

    # 64 patches / merge_unit 4 -> 16 image tokens in the LM sequence
    n_img_tokens = num_patches // (cfg["spatial_merge_size"] ** 2)
    input_ids = np.array([7, 8, 9, 10] + [cfg["image_token_id"]] * n_img_tokens
                         + [11, 12, 13, 14], dtype=np.int32)
    seq_len = input_ids.shape[0]
    mrope_positions = np.tile(np.arange(seq_len, dtype=np.int64), (3, 1))   # (3, S)

    logits = qwen25_vl_forward(params, input_ids, mrope_positions,
                               pixel_values, grid_thw, cfg)
    logits = jax.block_until_ready(logits)
    assert logits.shape == (1, cfg["vocab"])
    assert np.all(np.isfinite(np.asarray(logits)))
    print("KERNEL_OK")
</pallas_src>

<mosaic_0001>
module attributes {stable_mosaic.version = 11 : i64} {
  func.func @_matmul_kernel(%arg0: i32, %arg1: i32, %arg2: i32, %arg3: memref<64x24xf32, #tpu.memory_space<vmem>>, %arg4: memref<24x32xbf16, #tpu.memory_space<vmem>>, %arg5: memref<64x32xbf16, #tpu.memory_space<vmem>>, %arg6: memref<64x32xf32, #tpu.memory_space<vmem>>) attributes {dimension_semantics = [#tpu.dimension_semantics<parallel>, #tpu.dimension_semantics<parallel>, #tpu.dimension_semantics<arbitrary>], iteration_bounds = array<i64: 1, 1, 1>, scalar_prefetch = 0 : i64, scratch_operands = 1 : i64, tpu.core_type = #tpu.core_type<tc>, window_params = [{transform_indices = @transform_0, window_bounds = array<i64: 64, 24>}, {transform_indices = @transform_1, window_bounds = array<i64: 24, 32>}, {transform_indices = @transform_2, window_bounds = array<i64: 64, 32>}]} {
    %c0_i32 = arith.constant 0 : i32
    %0 = arith.cmpi eq, %arg2, %c0_i32 : i32
    %1 = arith.extui %0 : i1 to i32
    %c0_i32_0 = arith.constant 0 : i32
    %2 = arith.cmpi ne, %1, %c0_i32_0 : i32
    scf.if %2 {
      %cst_10 = arith.constant 0.000000e+00 : f32
      %13 = vector.broadcast %cst_10 : f32 to vector<64x32xf32>
      %c0_11 = arith.constant 0 : index
      %c0_12 = arith.constant 0 : index
      %14 = vector.load %arg6[%c0_11, %c0_12] : memref<64x32xf32, #tpu.memory_space<vmem>>, vector<64x32xf32>
      tpu.vector_store %arg6[%c0_11, %c0_12], %13 {strides = array<i32>} : memref<64x32xf32, #tpu.memory_space<vmem>>, vector<64x32xf32>,
    } else {
    }
    %c0 = arith.constant 0 : index
    %c0_1 = arith.constant 0 : index
    %3 = vector.load %arg6[%c0, %c0_1] : memref<64x32xf32, #tpu.memory_space<vmem>>, vector<64x32xf32>
    %c0_2 = arith.constant 0 : index
    %c0_3 = arith.constant 0 : index
    %4 = vector.load %arg3[%c0_2, %c0_3] : memref<64x24xf32, #tpu.memory_space<vmem>>, vector<64x24xf32>
    %5 = arith.truncf %4 : vector<64x24xf32> to vector<64x24xbf16>
    %c0_4 = arith.constant 0 : index
    %c0_5 = arith.constant 0 : index
    %6 = vector.load %arg4[%c0_4, %c0_5] : memref<24x32xbf16, #tpu.memory_space<vmem>>, vector<24x32xbf16>
    %cst = arith.constant dense<0.000000e+00> : vector<64x32xf32>
    %7 = tpu.matmul %5, %6, %cst {dimension_numbers = #tpu.dot_dimension_numbers<[1], [0], [0], [1], [0, 0, 1, 1], [], []>} : vector<64x24xbf16>, vector<24x32xbf16>, vector<64x32xf32> -> vector<64x32xf32>
    %8 = arith.addf %3, %7 : vector<64x32xf32>
    %c0_6 = arith.constant 0 : index
    %c0_7 = arith.constant 0 : index
    %9 = vector.load %arg6[%c0_6, %c0_7] : memref<64x32xf32, #tpu.memory_space<vmem>>, vector<64x32xf32>
    tpu.vector_store %arg6[%c0_6, %c0_7], %8 {strides = array<i32>} : memref<64x32xf32, #tpu.memory_space<vmem>>, vector<64x32xf32>,
    %c0_i32_8 = arith.constant 0 : i32
    %10 = arith.cmpi eq, %arg2, %c0_i32_8 : i32
    %11 = arith.extui %10 : i1 to i32
    %c0_i32_9 = arith.constant 0 : i32
    %12 = arith.cmpi ne, %11, %c0_i32_9 : i32
    scf.if %12 {
      %c0_10 = arith.constant 0 : index
      %c0_11 = arith.constant 0 : index
      %13 = vector.load %arg6[%c0_10, %c0_11] : memref<64x32xf32, #tpu.memory_space<vmem>>, vector<64x32xf32>
      %14 = arith.truncf %13 : vector<64x32xf32> to vector<64x32xbf16>
      %c0_12 = arith.constant 0 : index
      %c0_13 = arith.constant 0 : index
      %15 = vector.load %arg5[%c0_12, %c0_13] : memref<64x32xbf16, #tpu.memory_space<vmem>>, vector<64x32xbf16>
      tpu.vector_store %arg5[%c0_12, %c0_13], %14 {strides = array<i32>} : memref<64x32xbf16, #tpu.memory_space<vmem>>, vector<64x32xbf16>,
    } else {
    }
    return
  }
  func.func @transform_0(%arg0: i32, %arg1: i32, %arg2: i32) -> (i32, i32) {
    %c0_i32 = arith.constant 0 : i32
    return %arg0, %arg2 : i32, i32
  }
  func.func @transform_1(%arg0: i32, %arg1: i32, %arg2: i32) -> (i32, i32) {
    %c0_i32 = arith.constant 0 : i32
    return %arg2, %arg1 : i32, i32
  }
  func.func @transform_2(%arg0: i32, %arg1: i32, %arg2: i32) -> (i32, i32) {
    %c0_i32 = arith.constant 0 : i32
    return %arg0, %arg1 : i32, i32
  }
}

</mosaic_0001>

<bundles_post_ra>
// kernel: tpu_custom_call.1
= control target key start
LH: loop header
LB: loop body
LE: loop exit
PB: predicated region body
PF: predicated region fallthrough
CT: control target
= control target key end

     0   :  { %7 = vsyncpa [#allocation4], 0  ;;  %s479_s0 = inlined_call_operand.hbm [shape: f32[64,24], index: 0, kind: input, shape index: {}]   ;;  %s480_s1 = inlined_call_operand.hbm [shape: bf16[24,32], index: 1, kind: input, shape index: {}]   ;;  %s481_s2 = inlined_call_operand.hbm [shape: bf16[64,32], index: 2, kind: output, shape index: {}]  }
   0x1   :  { %8 = vsyncpa [#allocation7], 0 }
   0x2   :  { %9 = vsyncpa [#allocation5], 0  ;;  %s383_s9 = smov [#allocation3]   ;;  %s311_s13 = scalar_lea.hbm %s479_s0, 1024 }
   0x3   :  { %s15_s10 = sshll.u32 %s383_s9, 4  ;;  %p312_p0 = scmp.ne.s32.totalorder %s479_s0, %s311_s13  ;;  %s16_s10 = int_to_ptr.vmem [resolvable:$true] %s15_s10 }
   0x4   :  { %p315_p1 = scmp.lt.u32.totalorder %s311_s13, %s479_s0 }
   0x6   :  { %p317_p2 = pnand %p315_p1, %p312_p0 }
   0x8   :  { %320 = shalt.err (!%p317_p2)
}
   0x9   :  { %s321_s18 = scalar_lea.vmem %s16_s10, 1024  ;;  %p326_p4 = scmp.lt.s32.totalorder %s16_s10, %s16_s10 }
   0xa   :  { %p322_p3 = scmp.ne.s32.totalorder %s16_s10, %s321_s18  ;;  %p327_p5 = scmp.lt.s32.totalorder %s321_s18, %s321_s18 }
   0xc   :  { %p328_p6 = por %p327_p5, %p326_p4 }
   0xe   :  { %p329_p7 = pnand %p328_p6, %p322_p3 }
  0x10   :  { %332 = shalt.err (!%p329_p7)
}
  0x11   :  { %s384_s19 = smov 128   ;;  %s385_s20 = smov 8  }
  0x12   :  { %21 = dma.hbm_to_vmem [thread:$0]  %s479_s0, 1024, %s16_s10, [#allocation4], %s384_s19, %s384_s19, %s385_s20  }
  0x13   :  { %s386_s23 = smov [#allocation6]   ;;  %s333_s27 = scalar_lea.hbm %s480_s1, 192 }
  0x14   :  { %s27_s24 = sshll.u32 %s386_s23, 4  ;;  %p334_p8 = scmp.ne.s32.totalorder %s480_s1, %s333_s27  ;;  %s28_s24 = int_to_ptr.vmem [resolvable:$true] %s27_s24 }
  0x15   :  { %p337_p9 = scmp.lt.u32.totalorder %s333_s27, %s480_s1 }
  0x17   :  { %p339_p10 = pnand %p337_p9, %p334_p8 }
  0x19   :  { %342 = shalt.err (!%p339_p10)
}
  0x1a   :  { %s343_s4 = scalar_lea.vmem %s28_s24, 192  ;;  %p348_p12 = scmp.lt.s32.totalorder %s28_s24, %s28_s24 }
  0x1b   :  { %p344_p11 = scmp.ne.s32.totalorder %s28_s24, %s343_s4  ;;  %p349_p13 = scmp.lt.s32.totalorder %s343_s4, %s343_s4 }
  0x1d   :  { %p350_p0 = por %p349_p13, %p348_p12 }
  0x1f   :  { %p351_p1 = pnand %p350_p0, %p344_p11 }
  0x21   :  { %354 = shalt.err (!%p351_p1)
}
  0x22   :  { %s387_s0 = smov 64   ;;  %s388_s5 = smov 4  }
  0x23   :  { %33 = dma.hbm_to_vmem [thread:$0]  %s480_s1, 192, %s28_s24, [#allocation7], %s387_s0, %s387_s0, %s388_s5  }
  0x24   :  { %377 = dma.done.wait [#allocation4], 1024  }
  0x25   :  { %378 = vsyncadd [#allocation4], 4294966272 }
  0x26   :  { %379 = dma.done.wait [#allocation7], 192  }
  0x27   :  { %380 = vsyncadd [#allocation7], 4294967104  ;;  %vm45_vm0 = vcmask 261120   ;;  %v389_v0 = vmov 0.0   ;;  %v309_v1 = vld [vmem:[#allocation6] sm:$0xff]   ;;  %vm99_vm1 = vcmask 1043456  }
  0x28   :  { %48 = vst.msk [vmem:[#allocation2 + $0x10] sm:$0xff] %vm45_vm0, %v389_v0  ;;  %46 = vst.msk [vmem:[#allocation2] sm:$0xff] %vm45_vm0, %v389_v0  ;;  %v310_v2 = vld [vmem:[#allocation6 + $0x8] ss:$0 sps:$4 sm:$0xff]   ;;  %v62_v3 = vld [vmem:[#allocation3] sm:$0xff]  ;;  %283 = vmatprep.subr.bf16.mxu0 %v309_v1  ;;  %295 = vmatprep.subr.bf16.mxu1 %v309_v1  ;;  %vm86_vm2 = vcmask 195584  }
  0x29   :  { %47 = vst.msk [vmem:[#allocation2 + $0x8] sm:$0xff] %vm45_vm0, %v389_v0  ;;  %49 = vst.msk [vmem:[#allocation2 + $0x18] sm:$0xff] %vm45_vm0, %v389_v0  ;;  %v63_v4 = vld [vmem:[#allocation3 + $0x8] sm:$0xff]  ;;  %v66_v5 = vld [vmem:[#allocation3 + $0x20] sm:$0xff]  ;;  %284 = vmatpush3.bf16.msra.mxu0 %v309_v1  ;;  %297 = vmatpush3.bf16.msra.mxu1 %v309_v1  ;;  %v101_v12 = vsel %vm99_vm1, %v310_v2, 0  ;;  %vm228_vm3 = vcmask 257024  }
  0x2a   :  { %50 = vst.msk [vmem:[#allocation2 + $0x20] sm:$0xff] %vm45_vm0, %v389_v0  ;;  %51 = vst.msk [vmem:[#allocation2 + $0x28] sm:$0xff] %vm45_vm0, %v389_v0  ;;  %v67_v6 = vld [vmem:[#allocation3 + $0x28] sm:$0xff]  ;;  %v70_v7 = vpack.c.bf16 %v63_v4, %v62_v3  ;;  %v64_v9 = vld [vmem:[#allocation3 + $0x10] sm:$0xff]  ;;  %299 = vmatprep.subr.msk.bf16.mxu0 %vm99_vm1, %v310_v2  ;;  %300 = vmatprep.subr.msk.bf16.mxu1 %vm99_vm1, %v310_v2  ;;  %s390_s1 = smov [#allocation8]  }
  0x2b   :  { %52 = vst.msk [vmem:[#allocation2 + $0x30] sm:$0xff] %vm45_vm0, %v389_v0  ;;  %53 = vst.msk [vmem:[#allocation2 + $0x38] sm:$0xff] %vm45_vm0, %v389_v0  ;;  %v72_v8 = vpack.c.bf16 %v67_v6, %v66_v5  ;;  %v65_v10 = vld [vmem:[#allocation3 + $0x18] sm:$0xff]  ;;  %v68_v11 = vld [vmem:[#allocation3 + $0x30] sm:$0xff]  ;;  %s242_s8 = sshll.u32 %s390_s1, 4  ;;  %s243_s8 = int_to_ptr.vmem [resolvable:$true] %s242_s8 }
  0x2c   :  { %v69_v13 = vld [vmem:[#allocation3 + $0x38] sm:$0xff]  ;;  %287 = vmatprep.mubr.msk.bf16.mxu0 %vm86_vm2, %v70_v7  ;;  %v71_v14 = vpack.c.bf16 %v65_v10, %v64_v9  ;;  %s355_s9 = scalar_lea.vmem %s243_s8, 512  ;;  %p360_p3 = scmp.lt.s32.totalorder %s243_s8, %s243_s8 }
  0x2d   :  { %291 = vmatprep.mubr.msk.bf16.mxu1 %vm86_vm2, %v72_v8  ;;  %v73_v15 = vpack.c.bf16 %v69_v13, %v68_v11  ;;  %286 = vmatpush3.bf16.msra.mxu0 %v101_v12  ;;  %p356_p2 = scmp.ne.s32.totalorder %s243_s8, %s355_s9  ;;  %p361_p4 = scmp.lt.s32.totalorder %s355_s9, %s355_s9 }
  0x2e   :  { %298 = vmatpush3.bf16.msra.mxu1 %v101_v12 }
  0x2f   :  { %v56_v16 = vld [vmem:[#allocation2 + $0x10] sm:$0xff]  ;;  %v54_v18 = vld [vmem:[#allocation2] sm:$0xff]  ;;  %p362_p5 = por %p361_p4, %p360_p3 }
  0x30   :  { %288 = vmatmul.mubr.msk.bf16.vlgmr.msra.gmra.mrb[0].mxu0 %vm86_vm2, %v71_v14  ;;  %v57_v22 = vld [vmem:[#allocation2 + $0x18] sm:$0xff]  ;;  %v55_v28 = vld [vmem:[#allocation2 + $0x8] sm:$0xff] }
  0x31   :  { %292 = vmatmul.mubr.msk.bf16.vlgmr.msra.gmra.mrb[0].mxu1 %vm86_vm2, %v73_v15  ;;  %v58_v19 = vld [vmem:[#allocation2 + $0x20] sm:$0xff]  ;;  %v59_v29 = vld [vmem:[#allocation2 + $0x28] sm:$0xff]  ;;  %p363_p6 = pnand %p362_p5, %p356_p2 }
  0x32   :  { %v60_v17 = vld [vmem:[#allocation2 + $0x30] sm:$0xff]  ;;  %v61_v23 = vld [vmem:[#allocation2 + $0x38] sm:$0xff] }
 0x103   :  { %v289_v20 = vpop.f32.mrb[0].mxu0 }
 0x104   :  { %v293_v21 = vpop.f32.mrb[0].mxu1  ;;  %v170_v24 = vadd.f32 %v289_v20, %v56_v16  ;;  %v137_v26 = vpop.f32.mrb[1].mxu0 }
 0x105   :  { %v174_v25 = vadd.f32 %v293_v21, %v60_v17  ;;  %v153_v27 = vpop.f32.mrb[1].mxu1  ;;  %v168_v30 = vadd.f32 %v137_v26, %v54_v18  ;;  %v290_v32 = vpop.f32.mrb[2].mxu0 }
 0x106   :  { %v172_v31 = vadd.f32 %v153_v27, %v58_v19  ;;  %v294_v33 = vpop.f32.mrb[2].mxu1  ;;  %179 = vst.msk [vmem:[#allocation2 + $0x10] sm:$0xff] %vm45_vm0, %v170_v24  ;;  %v171_v34 = vadd.f32 %v290_v32, %v57_v22  ;;  %v140_v36 = vpop.f32.mrb[3].mxu0 }
 0x107   :  { %183 = vst.msk [vmem:[#allocation2 + $0x30] sm:$0xff] %vm45_vm0, %v174_v25  ;;  %v175_v35 = vadd.f32 %v294_v33, %v61_v23  ;;  %v156_v37 = vpop.f32.mrb[3].mxu1  ;;  %177 = vst.msk [vmem:[#allocation2] sm:$0xff] %vm45_vm0, %v168_v30  ;;  %v169_v38 = vadd.f32 %v140_v36, %v55_v28 }
 0x108   :  { %181 = vst.msk [vmem:[#allocation2 + $0x20] sm:$0xff] %vm45_vm0, %v172_v31  ;;  %v173_v39 = vadd.f32 %v156_v37, %v59_v29  ;;  %180 = vst.msk [vmem:[#allocation2 + $0x18] sm:$0xff] %vm45_vm0, %v171_v34 }
 0x109   :  { %184 = vst.msk [vmem:[#allocation2 + $0x38] sm:$0xff] %vm45_vm0, %v175_v35  ;;  %178 = vst.msk [vmem:[#allocation2 + $0x8] sm:$0xff] %vm45_vm0, %v169_v38 }
 0x10a   :  { %182 = vst.msk [vmem:[#allocation2 + $0x28] sm:$0xff] %vm45_vm0, %v173_v39 }
 0x10d   :  { %v190_v40 = vld [vmem:[#allocation2 + $0x10] sm:$0xff] }
 0x10e   :  { %v194_v41 = vld [vmem:[#allocation2 + $0x30] sm:$0xff]  ;;  %v188_v42 = vld [vmem:[#allocation2] sm:$0xff]  ;;  %v271_v44 = vpack.c.bf16 %v190_v40, %v190_v40 }
 0x10f   :  { %v192_v43 = vld [vmem:[#allocation2 + $0x20] sm:$0xff]  ;;  %v275_v45 = vpack.c.bf16 %v194_v41, %v194_v41  ;;  %v191_v46 = vld [vmem:[#allocation2 + $0x18] sm:$0xff]  ;;  %v269_v48 = vpack.c.bf16 %v188_v42, %v188_v42 }
 0x110   :  { %v195_v47 = vld [vmem:[#allocation2 + $0x38] sm:$0xff]  ;;  %v273_v49 = vpack.c.bf16 %v192_v43, %v192_v43  ;;  %v189_v50 = vld [vmem:[#allocation2 + $0x8] sm:$0xff]  ;;  %v272_v52 = vpack.c.bf16 %v191_v46, %v191_v46  ;;  %231 = vst.msk [vmem:[#allocation8 + $0x8] sm:$0xf] %vm228_vm3, %v271_v44 }
 0x111   :  { %v193_v51 = vld [vmem:[#allocation2 + $0x28] sm:$0xff]  ;;  %v276_v53 = vpack.c.bf16 %v195_v47, %v195_v47  ;;  %235 = vst.msk [vmem:[#allocation8 + $0x18] sm:$0xf] %vm228_vm3, %v275_v45  ;;  %v270_v54 = vpack.c.bf16 %v189_v50, %v189_v50  ;;  %229 = vst.msk [vmem:[#allocation8] sm:$0xf] %vm228_vm3, %v269_v48 }
 0x112   :  { %v274_v55 = vpack.c.bf16 %v193_v51, %v193_v51  ;;  %233 = vst.msk [vmem:[#allocation8 + $0x10] sm:$0xf] %vm228_vm3, %v273_v49  ;;  %232 = vst.msk [vmem:[#allocation8 + $0xc] sm:$0xf] %vm228_vm3, %v272_v52 }
 0x113   :  { %236 = vst.msk [vmem:[#allocation8 + $0x1c] sm:$0xf] %vm228_vm3, %v276_v53  ;;  %230 = vst.msk [vmem:[#allocation8 + $0x4] sm:$0xf] %vm228_vm3, %v270_v54 }
 0x114   :  { %234 = vst.msk [vmem:[#allocation8 + $0x14] sm:$0xf] %vm228_vm3, %v274_v55 }
 0x115   :  { %366 = shalt.err (!%p363_p6)
}
 0x116   :  { %s367_s12 = scalar_lea.hbm %s481_s2, 512 }
 0x117   :  { %p368_p7 = scmp.ne.s32.totalorder %s481_s2, %s367_s12  ;;  %p371_p8 = scmp.lt.u32.totalorder %s367_s12, %s481_s2 }
 0x119   :  { %p373_p9 = pnand %p371_p8, %p368_p7 }
 0x11b   :  { %376 = shalt.err (!%p373_p9)
}
 0x11c   :  { %248 = dma.vmem_to_hbm [thread:$0]  %s243_s8, 512, %s481_s2, [#allocation5], %s387_s0, %s387_s0, %s388_s5  }
 0x11d   :  { %381 = dma.done.wait [#allocation5], 512  }
 0x11e   :  { %382 = vsyncadd [#allocation5], 4294966784 }
 0x11f   :  { %252 = vsyncpa [#allocation4], 1 }
 0x120   :  { %253 = vsyncpa [#allocation7], 1 }
 0x121   :  { %254 = vsyncpa [#allocation5], 1 }

</bundles_post_ra>
